<compile_context>
chip_gen: v7x
topology: tpu7x:2x2x1
jax: 0.10.0
libtpu: 0.0.40
codegen_flags: <defaults>
</compile_context>

<pallas_src>
import math
import jax
import jax.numpy as jnp
from jax import lax
from jax.experimental import pallas as pl
from jax.experimental.pallas import tpu as pltpu


def _round_up(x, m):
    return ((x + m - 1) // m) * m


# ---------------------------------------------------------------------------
# Kernel 1: batched fused linear  y = x @ w + b   (non-recurrent, `parallel`)
# Used for the hoisted input projection and the hidden->vocab projection so
# the big matmuls run with (B*S) rows instead of sitting on the serial
# recurrence path with B=2 rows.
# ---------------------------------------------------------------------------
def _linear_kernel(x_ref, w_ref, b_ref, o_ref):
    # bf16 operands -> single-pass MXU matmul; f32 accumulation + f32 bias add.
    x = x_ref[...].astype(jnp.bfloat16)
    w = w_ref[...].astype(jnp.bfloat16)
    acc = jnp.dot(x, w, preferred_element_type=jnp.float32)
    o_ref[...] = (acc + b_ref[...]).astype(o_ref.dtype)


def pallas_linear(x2d, w, b, *, row_block=256, col_block=512,
                  vmem_limit_bytes=48 * 1024 * 1024):
    """(M,K) @ (K,N) + b, tiled over rows and output columns.

    row_block=None => single full-M row tile, so every (K, tn) weight block is
    streamed from HBM exactly once (use for the hidden->vocab projection where
    W_hq dominates HBM traffic).  Rows/cols are zero-padded to tile multiples
    (no non-divisible fallbacks that could blow VMEM).  Both grid axes are
    `parallel` so v7x can shard them across its two TensorCores.
    """
    M, K = x2d.shape
    Kw, N = w.shape
    assert K == Kw

    if row_block is None:
        tm = _round_up(M, 8)                      # one row block: weights read once
    else:
        tm = min(_round_up(row_block, 8), _round_up(M, 8))
    tn = min(_round_up(col_block, 128), _round_up(N, 128))
    Mp, Np = _round_up(M, tm), _round_up(N, tn)

    if Mp != M:
        x2d = jnp.pad(x2d, ((0, Mp - M), (0, 0)))
    if Np != N:
        w = jnp.pad(w, ((0, 0), (0, Np - N)))
        b = jnp.pad(b, (0, Np - N))
    b2 = b.astype(jnp.float32).reshape(1, Np)

    out = pl.pallas_call(
        _linear_kernel,
        out_shape=jax.ShapeDtypeStruct((Mp, Np), jnp.float32),
        grid_spec=pltpu.PrefetchScalarGridSpec(
            num_scalar_prefetch=0,
            grid=(Mp // tm, Np // tn),
            in_specs=[
                pl.BlockSpec((tm, K), lambda i, j: (i, 0)),
                pl.BlockSpec((K, tn), lambda i, j: (0, j)),
                pl.BlockSpec((1, tn), lambda i, j: (0, j)),
            ],
            out_specs=pl.BlockSpec((tm, tn), lambda i, j: (i, j)),
        ),
        compiler_params=pltpu.CompilerParams(
            dimension_semantics=("parallel", "parallel"),
            vmem_limit_bytes=vmem_limit_bytes),
    )(x2d, w, b2)
    return out[:M, :N]


# ---------------------------------------------------------------------------
# Kernel 2: sequential LSTM recurrence, time axis blocked, batch-major layout.
# ---------------------------------------------------------------------------
def _lstm_scan_kernel(xp_ref, wh_ref, h_out_ref, h_scr, c_scr):
    """One grid step == `Tt` time steps of the LSTM recurrence.

    xp_ref:      (B, Tt, 4H) f32  precomputed x_t @ Wx + b, gate order [i,f,o,c]
    wh_ref:      (H, 4H)     bf16 fused hidden->gate weights (single-buffered)
    h_out_ref:   (B, Tt, H)  f32  hidden states for this time block
    h_scr,c_scr: (B, H)      f32  recurrent carry, persists across grid steps
    """
    H = h_scr.shape[-1]
    Tt = xp_ref.shape[1]

    @pl.when(pl.program_id(0) == 0)
    def _():
        # init_lstm_state: zeros
        h_scr[...] = jnp.zeros_like(h_scr)
        c_scr[...] = jnp.zeros_like(c_scr)

    wh = wh_ref[...]          # loaded once per time block (constant index map)
    h = h_scr[...]
    c = c_scr[...]

    # TODO(synk): when (H, 4H) bf16 fits the MXU staging tiles, hold wh in MXU
    # weight registers across steps via pltpu.matmul_push_rhs/matmul_acc_lhs
    # instead of re-pushing it on every jnp.dot.
    for tt in range(Tt):      # static unroll; Tt <= 32
        # single fused (B,H)x(H,4H) bf16 matmul -> f32 gate pre-activations
        pre = xp_ref[:, tt, :] + jnp.dot(
            h.astype(jnp.bfloat16), wh, preferred_element_type=jnp.float32)
        i_g = jax.nn.sigmoid(pre[:, 0 * H:1 * H])   # f32 gate math (v5e: no bf16 VPU/EUP)
        f_g = jax.nn.sigmoid(pre[:, 1 * H:2 * H])
        o_g = jax.nn.sigmoid(pre[:, 2 * H:3 * H])
        c_t = jnp.tanh(pre[:, 3 * H:4 * H])
        c = f_g * c + i_g * c_t
        h = o_g * jnp.tanh(c)
        h_out_ref[:, tt, :] = h

    h_scr[...] = h
    c_scr[...] = c


def rnn_model_forward(sentence, params, *, time_block=32):
    """Equivalent of RNN_model.forward.  sentence: (B, S) int32 indices."""
    # TODO(synk): the nn.Embedding gather stays as plain-JAX indexing; fusing it
    # into the input projection needs num_scalar_prefetch=1 + a pl.Element
    # row-gather BlockSpec on the table (moderate win, mainly on v5e).
    emb = params["embedding"][sentence]                        # (B, S, E) f32
    B, S, E = emb.shape

    wx = params["wx"].astype(jnp.bfloat16)                     # (E, 4H)
    wh = params["wh"].astype(jnp.bfloat16)                     # (H, 4H)
    W_hq = params["W_hq"].astype(jnp.bfloat16)                 # (H, V)
    H4 = wx.shape[1]
    H = H4 // 4
    V = W_hq.shape[1]

    # --- hoisted input projection, batch-major (no (B,S,E)->(S,B,E) transpose)
    xp = pallas_linear(emb.reshape(B * S, E), wx, params["b"],
                       row_block=256).reshape(B, S, H4)

    # --- time-blocked sequential recurrence ----------------------------------
    Tt = max(8, (min(time_block, S) // 8) * 8)                 # sublane-aligned
    S_pad = _round_up(S, Tt)                                   # pad, never Tt=1
    if S_pad != S:
        xp = jnp.pad(xp, ((0, 0), (0, S_pad - S), (0, 0)))     # extra steps discarded

    h_seq = pl.pallas_call(
        _lstm_scan_kernel,
        out_shape=jax.ShapeDtypeStruct((B, S_pad, H), jnp.float32),
        grid_spec=pltpu.PrefetchScalarGridSpec(
            num_scalar_prefetch=0,
            grid=(S_pad // Tt,),
            in_specs=[
                pl.BlockSpec((B, Tt, H4), lambda t: (0, t, 0)),   # x projection
                # constant index map: keep a single weight buffer (bf16) instead
                # of the default double buffer (critical on v7x 64 MiB VMEM).
                pl.BlockSpec((H, H4), lambda t: (0, 0),
                             pipeline_mode=pl.Buffered(1)),
            ],
            out_specs=pl.BlockSpec((B, Tt, H), lambda t: (0, t, 0)),
            scratch_shapes=[pltpu.VMEM((B, H), jnp.float32),      # h carry
                            pltpu.VMEM((B, H), jnp.float32)],     # c carry
        ),
        compiler_params=pltpu.CompilerParams(
            dimension_semantics=("arbitrary",)),                  # true recurrence
    )(xp, wh)

    # --- hoisted hidden->vocab projection: full-M row tile so each W_hq block
    # is streamed from HBM exactly once; vocab axis stays `parallel` (2 TCs).
    h2d = h_seq[:, :S, :].reshape(B * S, H)
    logits = pallas_linear(h2d, W_hq, params["b_q"],
                           row_block=None).reshape(B, S, V)

    # TODO(synk): when S is a multiple of 128, fuse this permute into the vocab
    # projection's out_specs (transposed tile) to save an HBM roundtrip; with
    # S < 128 the lane dim would force masked stores, so keep it in XLA here.
    pred = jnp.transpose(logits, (0, 2, 1))                       # (B, V, S)
    return {"pred": pred.astype(jnp.float32)}


def rnn_model_reference(sentence, params):
    """Pure-JAX reference (mirrors the torch forward) for correctness check."""
    emb = params["embedding"][sentence].astype(jnp.float32)
    wx = params["wx"].astype(jnp.float32)
    wh = params["wh"].astype(jnp.float32)
    W_hq = params["W_hq"].astype(jnp.float32)
    b, b_q = params["b"], params["b_q"]

    x_seq = jnp.transpose(emb, (1, 0, 2))                        # (S, B, E)
    _, B, _ = x_seq.shape
    H = wh.shape[0]

    def step(carry, x_t):
        h, c = carry
        pre = x_t @ wx + h @ wh + b
        i_g = jax.nn.sigmoid(pre[:, 0 * H:1 * H])
        f_g = jax.nn.sigmoid(pre[:, 1 * H:2 * H])
        o_g = jax.nn.sigmoid(pre[:, 2 * H:3 * H])
        c_t = jnp.tanh(pre[:, 3 * H:4 * H])
        c_new = f_g * c + i_g * c_t
        h_new = o_g * jnp.tanh(c_new)
        return (h_new, c_new), h_new

    init = (jnp.zeros((B, H), jnp.float32), jnp.zeros((B, H), jnp.float32))
    _, hs = lax.scan(step, init, x_seq)                          # (S, B, H)
    logits = hs @ W_hq + b_q                                     # (S, B, V)
    return jnp.transpose(logits, (1, 2, 0))                      # (B, V, S)


def init_params(key, vocab_len, embedding_size, hidden_size):
    """Deterministic synthetic init mirroring the torch module's shapes.

    Gate weights are stored fused along the last dim in order [i, f, o, c]:
      wx: (E, 4H) bf16, wh: (H, 4H) bf16, b: (4H,) f32
    Matmul weights are stored bf16 (MXU-native, half the HBM/VMEM traffic);
    biases and the embedding table stay f32.
    """
    bound = math.sqrt(1.0 / hidden_size)
    keys = jax.random.split(key, 11)

    def u(k, shape):
        return jax.random.uniform(k, shape, jnp.float32, -bound, bound)

    E, H = embedding_size, hidden_size
    # word_embedding: normal(0, 1), shape (vocab, embed)
    emb = jax.random.normal(keys[0], (vocab_len, E), jnp.float32)

    Ws = [u(keys[1 + g], (E + H, H)) for g in range(4)]
    bs = [u(keys[5 + g], (H,)) for g in range(4)]
    wx = jnp.concatenate([W[:E] for W in Ws], axis=1).astype(jnp.bfloat16)   # (E, 4H)
    wh = jnp.concatenate([W[E:] for W in Ws], axis=1).astype(jnp.bfloat16)   # (H, 4H)
    b = jnp.concatenate(bs)                                                  # (4H,) f32

    W_hq = u(keys[9], (H, vocab_len)).astype(jnp.bfloat16)                   # (H, V)
    b_q = u(keys[10], (vocab_len,))                                          # (V,) f32
    return dict(embedding=emb, wx=wx, wh=wh, b=b, W_hq=W_hq, b_q=b_q)


if __name__ == "__main__":
    vocab_len, embedding_size, hidden_size = 64, 16, 32
    batch, seq = 2, 8

    key = jax.random.PRNGKey(0)
    pkey, skey = jax.random.split(key)
    params = init_params(pkey, vocab_len, embedding_size, hidden_size)
    sentence = jax.random.randint(skey, (batch, seq), 0, vocab_len,
                                  dtype=jnp.int32)

    out = rnn_model_forward(sentence, params, time_block=32)
    pred = jax.block_until_ready(out["pred"])
    assert pred.shape == (batch, vocab_len, seq)
    assert pred.dtype == jnp.float32

    ref = jax.block_until_ready(rnn_model_reference(sentence, params))
    max_err = float(jnp.max(jnp.abs(pred - ref)))
    assert max_err < 5e-2, f"max abs err vs reference: {max_err}"
    print("KERNEL_OK")
</pallas_src>

<mosaic_0001>
module attributes {stable_mosaic.version = 11 : i64} {
  func.func @_linear_kernel(%arg0: i32, %arg1: i32, %arg2: memref<16x16xf32, #tpu.memory_space<vmem>>, %arg3: memref<16x128xbf16, #tpu.memory_space<vmem>>, %arg4: memref<1x128xf32, #tpu.memory_space<vmem>>, %arg5: memref<16x128xf32, #tpu.memory_space<vmem>>) attributes {dimension_semantics = [#tpu.dimension_semantics<parallel>, #tpu.dimension_semantics<parallel>], iteration_bounds = array<i64: 1, 1>, scalar_prefetch = 0 : i64, scratch_operands = 0 : i64, tpu.core_type = #tpu.core_type<tc>, window_params = [{transform_indices = @transform_0, window_bounds = array<i64: 16, 16>}, {transform_indices = @transform_1, window_bounds = array<i64: 16, 128>}, {transform_indices = @transform_2, window_bounds = array<i64: 1, 128>}, {transform_indices = @transform_3, window_bounds = array<i64: 16, 128>}]} {
    %c0 = arith.constant 0 : index
    %c0_0 = arith.constant 0 : index
    %0 = vector.load %arg2[%c0, %c0_0] : memref<16x16xf32, #tpu.memory_space<vmem>>, vector<16x16xf32>
    %1 = arith.truncf %0 : vector<16x16xf32> to vector<16x16xbf16>
    %c0_1 = arith.constant 0 : index
    %c0_2 = arith.constant 0 : index
    %2 = vector.load %arg3[%c0_1, %c0_2] : memref<16x128xbf16, #tpu.memory_space<vmem>>, vector<16x128xbf16>
    %cst = arith.constant dense<0.000000e+00> : vector<16x128xf32>
    %3 = tpu.matmul %1, %2, %cst {dimension_numbers = #tpu.dot_dimension_numbers<[1], [0], [0], [1], [0, 0, 1, 1], [], []>} : vector<16x16xbf16>, vector<16x128xbf16>, vector<16x128xf32> -> vector<16x128xf32>
    %c0_3 = arith.constant 0 : index
    %c0_4 = arith.constant 0 : index
    %4 = vector.load %arg4[%c0_3, %c0_4] : memref<1x128xf32, #tpu.memory_space<vmem>>, vector<1x128xf32>
    %5 = vector.broadcast %4 : vector<1x128xf32> to vector<16x128xf32>
    %6 = arith.addf %3, %5 : vector<16x128xf32>
    %c0_5 = arith.constant 0 : index
    %c0_6 = arith.constant 0 : index
    %7 = vector.load %arg5[%c0_5, %c0_6] : memref<16x128xf32, #tpu.memory_space<vmem>>, vector<16x128xf32>
    tpu.vector_store %arg5[%c0_5, %c0_6], %6 {strides = array<i32>} : memref<16x128xf32, #tpu.memory_space<vmem>>, vector<16x128xf32>,
    return
  }
  func.func @transform_0(%arg0: i32, %arg1: i32) -> (i32, i32) {
    %c0_i32 = arith.constant 0 : i32
    %c0_i32_0 = arith.constant 0 : i32
    return %arg0, %c0_i32 : i32, i32
  }
  func.func @transform_1(%arg0: i32, %arg1: i32) -> (i32, i32) {
    %c0_i32 = arith.constant 0 : i32
    %c0_i32_0 = arith.constant 0 : i32
    return %c0_i32, %arg1 : i32, i32
  }
  func.func @transform_2(%arg0: i32, %arg1: i32) -> (i32, i32) {
    %c0_i32 = arith.constant 0 : i32
    %c0_i32_0 = arith.constant 0 : i32
    return %c0_i32, %arg1 : i32, i32
  }
  func.func @transform_3(%arg0: i32, %arg1: i32) -> (i32, i32) {
    %c0_i32 = arith.constant 0 : i32
    return %arg0, %arg1 : i32, i32
  }
}

</mosaic_0001>

<bundles_post_ra>
// kernel: tpu_custom_call.1
= control target key start
LH: loop header
LB: loop body
LE: loop exit
PB: predicated region body
PF: predicated region fallthrough
CT: control target
= control target key end

     0   :  { %8 = vsyncpa [#allocation3], 0  ;;  %s294_s0 = inlined_call_operand.hbm [shape: f32[16,16], index: 0, kind: input, shape index: {}]   ;;  %s295_s1 = inlined_call_operand.hbm [shape: bf16[16,128], index: 1, kind: input, shape index: {}]   ;;  %s296_s2 = inlined_call_operand.vmem [shape: f32[1,128], index: 2, kind: input, shape index: {}]   ;;  %s297_s3 = inlined_call_operand.hbm [shape: f32[16,128], index: 3, kind: output, shape index: {}]  }
   0x1   :  { %9 = vsyncpa [#allocation6], 0 }
   0x2   :  { %10 = vsyncpa [#allocation4], 0  ;;  %s220_s12 = smov [#allocation2]   ;;  %s148_s16 = scalar_lea.hbm %s294_s0, 256 }
   0x3   :  { %s16_s13 = sshll.u32 %s220_s12, 4  ;;  %p149_p0 = scmp.ne.s32.totalorder %s294_s0, %s148_s16  ;;  %s17_s13 = int_to_ptr.vmem [resolvable:$true] %s16_s13 }
   0x4   :  { %p152_p1 = scmp.lt.u32.totalorder %s148_s16, %s294_s0 }
   0x6   :  { %p154_p2 = pnand %p152_p1, %p149_p0 }
   0x8   :  { %157 = shalt.err (!%p154_p2)
}
   0x9   :  { %s158_s21 = scalar_lea.vmem %s17_s13, 256  ;;  %p163_p4 = scmp.lt.s32.totalorder %s17_s13, %s17_s13 }
   0xa   :  { %p159_p3 = scmp.ne.s32.totalorder %s17_s13, %s158_s21  ;;  %p164_p5 = scmp.lt.s32.totalorder %s158_s21, %s158_s21 }
   0xc   :  { %p165_p6 = por %p164_p5, %p163_p4 }
   0xe   :  { %p166_p7 = pnand %p165_p6, %p159_p3 }
  0x10   :  { %169 = shalt.err (!%p166_p7)
}
  0x11   :  { %s221_s22 = smov 128   ;;  %s222_s23 = smov 8  }
  0x12   :  { %22 = dma.hbm_to_vmem [thread:$0]  %s294_s0, 256, %s17_s13, [#allocation3], %s221_s22, %s221_s22, %s222_s23  }
  0x13   :  { %s223_s26 = smov [#allocation5]   ;;  %s170_s30 = scalar_lea.hbm %s295_s1, 128 }
  0x14   :  { %s28_s27 = sshll.u32 %s223_s26, 4  ;;  %p171_p8 = scmp.ne.s32.totalorder %s295_s1, %s170_s30  ;;  %s29_s27 = int_to_ptr.vmem [resolvable:$true] %s28_s27 }
  0x15   :  { %p174_p9 = scmp.lt.u32.totalorder %s170_s30, %s295_s1 }
  0x17   :  { %p176_p10 = pnand %p174_p9, %p171_p8 }
  0x19   :  { %179 = shalt.err (!%p176_p10)
}
  0x1a   :  { %s180_s8 = scalar_lea.vmem %s29_s27, 128  ;;  %p185_p12 = scmp.lt.s32.totalorder %s29_s27, %s29_s27 }
  0x1b   :  { %p181_p11 = scmp.ne.s32.totalorder %s29_s27, %s180_s8  ;;  %p186_p13 = scmp.lt.s32.totalorder %s180_s8, %s180_s8 }
  0x1d   :  { %p187_p0 = por %p186_p13, %p185_p12 }
  0x1f   :  { %p188_p1 = pnand %p187_p0, %p181_p11 }
  0x21   :  { %191 = shalt.err (!%p188_p1)
}
  0x22   :  { %s224_s0 = smov 64   ;;  %s225_s9 = smov 4  }
  0x23   :  { %34 = dma.hbm_to_vmem [thread:$0]  %s295_s1, 128, %s29_s27, [#allocation6], %s224_s0, %s224_s0, %s225_s9  }
  0x24   :  { %214 = dma.done.wait [#allocation3], 256  }
  0x25   :  { %215 = vsyncadd [#allocation3], 4294967040 }
  0x26   :  { %216 = dma.done.wait [#allocation6], 128  }
  0x27   :  { %217 = vsyncadd [#allocation6], 4294967168  ;;  %v226_v0 = vmov 0.0   ;;  %vm227_vm0 = vmmov 0   ;;  %v147_v1 = vld [vmem:[#allocation5] sm:$0xff]   ;;  %v44_v2 = vld [vmem:[#allocation2] sm:$0xff] }
  0x28   :  { %132 = vmatprep.subr.bf16.mxu0 %v226_v0  ;;  %134 = vmatprep.mubr.msk.bf16.mxu0 %vm227_vm0, %v226_v0  ;;  %v45_v3 = vld [vmem:[#allocation2 + $0x8] sm:$0xff]  ;;  %vm62_vm1 = vcmask 130048   ;;  %v127_v5 = vld [vmem:[%s296_s2] ss:$0 sm:$0xff]  ;;  %s228_s1 = smov [#allocation7]  }
  0x29   :  { %133 = vmatpush3.bf16.msra.mxu0 %v147_v1  ;;  %v46_v4 = vpack.c.bf16 %v45_v3, %v44_v2  ;;  %s114_s14 = sshll.u32 %s228_s1, 4  ;;  %s115_s14 = int_to_ptr.vmem [resolvable:$true] %s114_s14 }
  0x2a   :  { %s192_s15 = scalar_lea.vmem %s115_s14, 256  ;;  %p197_p3 = scmp.lt.s32.totalorder %s115_s14, %s115_s14 }
  0x2b   :  { %p193_p2 = scmp.ne.s32.totalorder %s115_s14, %s192_s15  ;;  %p198_p4 = scmp.lt.s32.totalorder %s192_s15, %s192_s15 }
  0x2c   :  { %135 = vmatmul.mubr.msk.bf16.vlgmr.msra.gmra.mrb[0].mxu0 %vm62_vm1, %v46_v4 }
  0x2d   :  { %p199_p5 = por %p198_p4, %p197_p3 }
  0x2f   :  { %p200_p6 = pnand %p199_p5, %p193_p2 }
  0xff   :  { %v100_v6 = vpop.f32.mrb[0].mxu0 }
 0x100   :  { %v101_v7 = vadd.f32 %v127_v5, %v100_v6  ;;  %v136_v8 = vpop.f32.mrb[1].mxu0 }
 0x101   :  { %v103_v9 = vpop.f32.mrb[2].mxu0 }
 0x102   :  { %107 = vst [vmem:[#allocation7] sm:$0xff] %v101_v7  ;;  %v104_v10 = vadd.f32 %v127_v5, %v103_v9  ;;  %v137_v11 = vpop.f32.mrb[3].mxu0 }
 0x104   :  { %108 = vst [vmem:[#allocation7 + $0x8] sm:$0xff] %v104_v10 }
 0x105   :  { %203 = shalt.err (!%p200_p6)
}
 0x106   :  { %s204_s17 = scalar_lea.hbm %s297_s3, 256 }
 0x107   :  { %p205_p7 = scmp.ne.s32.totalorder %s297_s3, %s204_s17  ;;  %p208_p8 = scmp.lt.u32.totalorder %s204_s17, %s297_s3 }
 0x109   :  { %p210_p9 = pnand %p208_p8, %p205_p7 }
 0x10b   :  { %213 = shalt.err (!%p210_p9)
}
 0x10c   :  { %120 = dma.vmem_to_hbm [thread:$0]  %s115_s14, 256, %s297_s3, [#allocation4], %s221_s22, %s221_s22, %s222_s23  }
 0x10d   :  { %218 = dma.done.wait [#allocation4], 256  }
 0x10e   :  { %219 = vsyncadd [#allocation4], 4294967040 }
 0x10f   :  { %124 = vsyncpa [#allocation3], 1 }
 0x110   :  { %125 = vsyncpa [#allocation6], 1 }
 0x111   :  { %126 = vsyncpa [#allocation4], 1 }

</bundles_post_ra>
